<compile_context>
chip_gen: v7x
topology: tpu7x:2x2x1
jax: 0.10.0
libtpu: 0.0.40
codegen_flags: <defaults>
</compile_context>

<pallas_src>
import functools

import jax
import jax.numpy as jnp
import numpy as np
from jax.experimental import pallas as pl
from jax.experimental.pallas import tpu as pltpu


# --------------------------------------------------------------------------
# Kernels
#   grid = (row tiles i, C tiles k, d_out tiles j)   (j innermost)
#   scratch: acts_ref (tm, tc) compute-dtype, acc_ref (nj, tm, tn) f32
# --------------------------------------------------------------------------
def _lc_kernel_masked(x_ref, a_ref, b_ref, m_ref, bias_ref, o_ref,
                      acts_ref, acc_ref):
    k = pl.program_id(1)
    j = pl.program_id(2)

    # component_acts tile = (x @ A) * mask  -> computed once per (i, k), cached.
    @pl.when(j == 0)
    def _():
        acts = jnp.dot(x_ref[...], a_ref[...],
                       preferred_element_type=jnp.float32)
        acts = acts * m_ref[...].astype(jnp.float32)
        acts_ref[...] = acts.astype(acts_ref.dtype)

    partial = jnp.dot(acts_ref[...], b_ref[...],
                      preferred_element_type=jnp.float32)

    @pl.when(k == 0)
    def _():
        acc_ref[j] = partial

    @pl.when(k > 0)
    def _():
        acc_ref[j] = acc_ref[j] + partial

    @pl.when(k == pl.num_programs(1) - 1)
    def _():
        o_ref[...] = (acc_ref[j]
                      + bias_ref[...].astype(jnp.float32)).astype(o_ref.dtype)


def _lc_kernel_nomask(x_ref, a_ref, b_ref, bias_ref, o_ref,
                      acts_ref, acc_ref):
    k = pl.program_id(1)
    j = pl.program_id(2)

    @pl.when(j == 0)
    def _():
        acts = jnp.dot(x_ref[...], a_ref[...],
                       preferred_element_type=jnp.float32)
        acts_ref[...] = acts.astype(acts_ref.dtype)

    partial = jnp.dot(acts_ref[...], b_ref[...],
                      preferred_element_type=jnp.float32)

    @pl.when(k == 0)
    def _():
        acc_ref[j] = partial

    @pl.when(k > 0)
    def _():
        acc_ref[j] = acc_ref[j] + partial

    @pl.when(k == pl.num_programs(1) - 1)
    def _():
        o_ref[...] = (acc_ref[j]
                      + bias_ref[...].astype(jnp.float32)).astype(o_ref.dtype)


# --------------------------------------------------------------------------
# Tiling helpers
# --------------------------------------------------------------------------
def _round_up(x, m):
    return (x + m - 1) // m * m


def _lane_tiles(full):
    """Multiples of 128 that evenly divide `full` (a multiple of 128), descending."""
    return [t for t in range(full, 0, -128) if full % t == 0]


def _next_smaller(opts, cur):
    for t in opts:
        if t < cur:
            return t
    return cur


@functools.lru_cache(maxsize=1)
def _vmem_budget_bytes():
    """~60% of per-core VMEM capacity (v7x: ~38 MiB, v5e/v6e: ~77 MiB)."""
    cap = 64 * 1024 * 1024  # conservative default (v7x)
    try:
        info = pltpu.get_tpu_info()
        cap = int(getattr(info, "vmem_capacity_bytes", cap) or cap)
    except Exception:
        pass
    return int(0.60 * cap)


def _footprint(tm, tc, tn, *, d_in, d_out_p, cd_bytes, out_bytes, masked):
    f = (2 * tm * d_in * cd_bytes        # x block (double buffered)
         + 2 * d_in * tc * cd_bytes      # A block
         + 2 * tc * tn * cd_bytes        # B block
         + 2 * tn * 4                    # bias block (f32)
         + 2 * tm * tn * out_bytes       # out block
         + tm * tc * cd_bytes            # acts scratch
         + tm * d_out_p * 4)             # f32 accumulator (nj * tm * tn)
    if masked:
        f += 2 * tm * tc * cd_bytes      # mask block
    return f


def _select_tiles(n_rows, d_in, C_p, d_out_p, *, cd_bytes, out_bytes, masked,
                  row_tile, budget, max_dout_tile=None):
    tm = min(int(row_tile), _round_up(n_rows, 16))
    tm = _round_up(tm, 16)
    # >= 2 row tiles whenever rows permit so both v7x TensorCores get work
    # (near-free on v5e/v6e: ~0.35us extra grid-step overhead).
    if n_rows >= 32 and _round_up(n_rows, tm) // tm < 2:
        tm = _round_up(-(-n_rows // 2), 16)

    tc_opts = _lane_tiles(C_p)
    tn_opts = _lane_tiles(d_out_p)
    tc = next((t for t in tc_opts if t <= 512), tc_opts[-1])
    if max_dout_tile is None:
        tn = tn_opts[0]          # prefer a single d_out tile (nj == 1)
    else:
        cap = max(128, int(max_dout_tile))
        tn = next((t for t in tn_opts if t <= cap), tn_opts[-1])

    target = int(0.8 * budget)   # leave headroom for compiler-internal scratch

    def fp():
        return _footprint(tm, tc, tn, d_in=d_in, d_out_p=d_out_p,
                          cd_bytes=cd_bytes, out_bytes=out_bytes, masked=masked)

    while fp() > target:
        if tc > 128:
            tc = _next_smaller(tc_opts, tc)
            continue
        if tm > 64:
            tm = max(64, _round_up(tm // 2, 16))
            continue
        new_tn = _next_smaller(tn_opts, tn)
        if tn > 512 and new_tn != tn:
            tn = new_tn
            continue
        if tm > 16:
            tm = max(16, _round_up(tm // 2, 16))
            continue
        if new_tn != tn:
            tn = new_tn
            continue
        # TODO(synk): tile d_in (extra reduction stage / emit_pipeline) when even
        # minimal (tm=16, tc=128, tn=128) tiles exceed the VMEM budget for very
        # wide layers; currently we rely on the compiler's vmem_limit headroom.
        break
    return tm, tc, tn


# --------------------------------------------------------------------------
# Wrapper
# --------------------------------------------------------------------------
@functools.partial(jax.jit,
                   static_argnames=("row_tile", "compute_dtype", "max_dout_tile"))
def linear_component_forward(x, A, B, mask=None, bias=None, *,
                             row_tile=None, compute_dtype=jnp.bfloat16,
                             max_dout_tile=None):
    """Pallas forward for LinearComponent.

    x:    (..., d_in)
    A:    (d_in, C)
    B:    (C, d_out)
    mask: broadcastable to (..., C), or None
    bias: (d_out,) or None
    Returns (..., d_out) in x.dtype (bf16 MXU operands, f32 accumulation).
    """
    d_in, C = A.shape
    _, d_out = B.shape
    lead_shape = x.shape[:-1]
    n_rows = int(np.prod(lead_shape)) if lead_shape else 1
    out_dtype = x.dtype
    cdt = jnp.dtype(compute_dtype)
    cd_bytes = cdt.itemsize
    out_bytes = jnp.dtype(out_dtype).itemsize

    budget = _vmem_budget_bytes()
    if row_tile is None:
        row_tile = 512 if budget >= 56 * 1024 * 1024 else 256

    C_p = _round_up(C, 128)
    d_out_p = _round_up(d_out, 128)

    tm, tc, tn = _select_tiles(
        n_rows, d_in, C_p, d_out_p, cd_bytes=cd_bytes, out_bytes=out_bytes,
        masked=mask is not None, row_tile=row_tile, budget=budget,
        max_dout_tile=max_dout_tile)

    n_rows_p = _round_up(n_rows, tm)
    grid = (n_rows_p // tm, C_p // tc, d_out_p // tn)
    nj = grid[2]

    # ---- operands (cast / pad only when actually required) -----------------
    x2 = x.reshape(n_rows, d_in)
    if x2.dtype != cdt:
        x2 = x2.astype(cdt)
    if n_rows_p != n_rows:
        x2 = jnp.pad(x2, ((0, n_rows_p - n_rows), (0, 0)))

    A_p = A if A.dtype == cdt else A.astype(cdt)
    if C_p != C:
        A_p = jnp.pad(A_p, ((0, 0), (0, C_p - C)))
    B_p = B if B.dtype == cdt else B.astype(cdt)
    if C_p != C or d_out_p != d_out:
        B_p = jnp.pad(B_p, ((0, C_p - C), (0, d_out_p - d_out)))

    if bias is None:
        bias_p = jnp.zeros((1, d_out_p), jnp.float32)
    else:
        bias_p = bias.astype(jnp.float32).reshape(1, d_out)
        if d_out_p != d_out:
            bias_p = jnp.pad(bias_p, ((0, 0), (0, d_out_p - d_out)))

    x_spec = pl.BlockSpec((tm, d_in), lambda i, k, j: (i, 0))
    a_spec = pl.BlockSpec((d_in, tc), lambda i, k, j: (0, k))
    b_spec = pl.BlockSpec((tc, tn), lambda i, k, j: (k, j))
    bias_spec = pl.BlockSpec((1, tn), lambda i, k, j: (0, j))
    out_spec = pl.BlockSpec((tm, tn), lambda i, k, j: (i, j))
    scratch = [pltpu.VMEM((tm, tc), cdt),              # cached (x @ A)[*mask] tile
               pltpu.VMEM((nj, tm, tn), jnp.float32)]  # per-d_out-tile accumulator

    cparams = pltpu.CompilerParams(
        dimension_semantics=("parallel", "arbitrary", "arbitrary"),
        vmem_limit_bytes=budget,
    )

    if mask is None:
        kernel = _lc_kernel_nomask
        operands = (x2, A_p, B_p, bias_p)
        in_specs = [x_spec, a_spec, b_spec, bias_spec]
    else:
        m2 = mask if mask.dtype == cdt else mask.astype(cdt)
        if m2.shape != lead_shape + (C,):
            m2 = jnp.broadcast_to(m2, lead_shape + (C,))
        m2 = m2.reshape(n_rows, C)
        if n_rows_p != n_rows or C_p != C:
            m2 = jnp.pad(m2, ((0, n_rows_p - n_rows), (0, C_p - C)))
        mask_spec = pl.BlockSpec((tm, tc), lambda i, k, j: (i, k))
        kernel = _lc_kernel_masked
        operands = (x2, A_p, B_p, m2, bias_p)
        in_specs = [x_spec, a_spec, b_spec, mask_spec, bias_spec]

    out2 = pl.pallas_call(
        kernel,
        out_shape=jax.ShapeDtypeStruct((n_rows_p, d_out_p), out_dtype),
        grid_spec=pltpu.PrefetchScalarGridSpec(
            num_scalar_prefetch=0,
            grid=grid,
            in_specs=in_specs,
            out_specs=out_spec,
            scratch_shapes=scratch),
        compiler_params=cparams,
    )(*operands)

    return out2[:n_rows, :d_out].reshape(lead_shape + (d_out,))


# --------------------------------------------------------------------------
# Reference + test
# --------------------------------------------------------------------------
def _init_param(key, shape, fan_val):
    # Deterministic stand-in for init_param_: normal scaled by 1/sqrt(fan_val)
    return (jax.random.normal(key, shape, dtype=jnp.float32)
            / jnp.sqrt(jnp.float32(fan_val)))


def _ref_forward(x, A, B, mask, bias, cdt=jnp.bfloat16):
    """Pure-JAX reference following the same bf16-operand / f32-accumulate path."""
    d_in, C = A.shape
    d_out = B.shape[1]
    xb = x.reshape(-1, d_in).astype(cdt)
    acts = jnp.einsum("rd,dc->rc", xb, A.astype(cdt),
                      preferred_element_type=jnp.float32)
    if mask is not None:
        m = jnp.broadcast_to(mask, x.shape[:-1] + (C,)).reshape(-1, C)
        acts = acts * m.astype(cdt).astype(jnp.float32)
    out = jnp.einsum("rc,co->ro", acts.astype(cdt), B.astype(cdt),
                     preferred_element_type=jnp.float32)
    if bias is not None:
        out = out + bias
    return out.reshape(x.shape[:-1] + (d_out,)).astype(x.dtype)


if __name__ == "__main__":
    key = jax.random.PRNGKey(0)
    kx, ka, kb, kbias, kmask, kx2, ka2, kb2, kmask2 = jax.random.split(key, 9)

    # ---- test 1: small shapes consistent with the module (grid = (1,1,1)) --
    batch, seq, d_in, C, d_out = 2, 8, 32, 16, 32
    x = jax.random.normal(kx, (batch, seq, d_in), dtype=jnp.float32)
    A = _init_param(ka, (d_in, C), fan_val=d_out)
    B = _init_param(kb, (C, d_out), fan_val=C)
    bias = 0.1 * jax.random.normal(kbias, (d_out,), dtype=jnp.float32)
    mask = (jax.random.uniform(kmask, (batch, seq, C)) > 0.3).astype(jnp.float32)

    out_masked = linear_component_forward(x, A, B, mask=mask, bias=bias)
    out_nomask = linear_component_forward(x, A, B, mask=None, bias=bias)
    out_masked, out_nomask = jax.block_until_ready((out_masked, out_nomask))
    np.testing.assert_allclose(np.asarray(out_masked),
                               np.asarray(_ref_forward(x, A, B, mask, bias)),
                               rtol=1e-2, atol=1e-2)
    np.testing.assert_allclose(np.asarray(out_nomask),
                               np.asarray(_ref_forward(x, A, B, None, bias)),
                               rtol=1e-2, atol=1e-2)

    # ---- test 2: multi-tile grid (2 row tiles, 2 C tiles, single d_out tile)
    b2, s2, din2, C2, dout2 = 2, 128, 64, 1024, 256
    x_b = jax.random.normal(kx2, (b2, s2, din2), dtype=jnp.float32)
    A_b = _init_param(ka2, (din2, C2), fan_val=dout2)
    B_b = _init_param(kb2, (C2, dout2), fan_val=C2)
    mask_b = (jax.random.uniform(kmask2, (b2, s2, C2)) > 0.5).astype(jnp.float32)

    out_b = linear_component_forward(x_b, A_b, B_b, mask=mask_b, bias=None,
                                     row_tile=128)
    out_b = jax.block_until_ready(out_b)
    np.testing.assert_allclose(np.asarray(out_b),
                               np.asarray(_ref_forward(x_b, A_b, B_b, mask_b, None)),
                               rtol=2e-2, atol=2e-2)

    # ---- test 3: force nj > 1 to exercise the per-j accumulator path -------
    out_c = linear_component_forward(x_b, A_b, B_b, mask=mask_b, bias=None,
                                     row_tile=128, max_dout_tile=128)
    out_c = jax.block_until_ready(out_c)
    np.testing.assert_allclose(np.asarray(out_c),
                               np.asarray(_ref_forward(x_b, A_b, B_b, mask_b, None)),
                               rtol=2e-2, atol=2e-2)

    print("KERNEL_OK")
</pallas_src>

<mosaic_0001>
module attributes {stable_mosaic.version = 11 : i64} {
  func.func @_lc_kernel_masked(%arg0: i32, %arg1: i32, %arg2: i32, %arg3: memref<16x32xbf16, #tpu.memory_space<vmem>>, %arg4: memref<32x128xbf16, #tpu.memory_space<vmem>>, %arg5: memref<128x128xbf16, #tpu.memory_space<vmem>>, %arg6: memref<16x128xbf16, #tpu.memory_space<vmem>>, %arg7: memref<1x128xf32, #tpu.memory_space<vmem>>, %arg8: memref<16x128xf32, #tpu.memory_space<vmem>>, %arg9: memref<16x128xbf16, #tpu.memory_space<vmem>>, %arg10: memref<1x16x128xf32, #tpu.memory_space<vmem>>) attributes {dimension_semantics = [#tpu.dimension_semantics<parallel>, #tpu.dimension_semantics<arbitrary>, #tpu.dimension_semantics<arbitrary>], iteration_bounds = array<i64: 1, 1, 1>, scalar_prefetch = 0 : i64, scratch_operands = 2 : i64, tpu.core_type = #tpu.core_type<tc>, window_params = [{transform_indices = @transform_0, window_bounds = array<i64: 16, 32>}, {transform_indices = @transform_1, window_bounds = array<i64: 32, 128>}, {transform_indices = @transform_2, window_bounds = array<i64: 128, 128>}, {transform_indices = @transform_3, window_bounds = array<i64: 16, 128>}, {transform_indices = @transform_4, window_bounds = array<i64: 1, 128>}, {transform_indices = @transform_5, window_bounds = array<i64: 16, 128>}]} {
    %c0_i32 = arith.constant 0 : i32
    %0 = arith.cmpi eq, %arg2, %c0_i32 : i32
    %1 = arith.extui %0 : i1 to i32
    %c0_i32_0 = arith.constant 0 : i32
    %2 = arith.cmpi ne, %1, %c0_i32_0 : i32
    scf.if %2 {
      %c0_10 = arith.constant 0 : index
      %c0_11 = arith.constant 0 : index
      %15 = vector.load %arg3[%c0_10, %c0_11] : memref<16x32xbf16, #tpu.memory_space<vmem>>, vector<16x32xbf16>
      %c0_12 = arith.constant 0 : index
      %c0_13 = arith.constant 0 : index
      %16 = vector.load %arg4[%c0_12, %c0_13] : memref<32x128xbf16, #tpu.memory_space<vmem>>, vector<32x128xbf16>
      %cst_14 = arith.constant dense<0.000000e+00> : vector<16x128xf32>
      %17 = tpu.matmul %15, %16, %cst_14 {dimension_numbers = #tpu.dot_dimension_numbers<[1], [0], [0], [1], [0, 0, 1, 1], [], []>} : vector<16x32xbf16>, vector<32x128xbf16>, vector<16x128xf32> -> vector<16x128xf32>
      %c0_15 = arith.constant 0 : index
      %c0_16 = arith.constant 0 : index
      %18 = vector.load %arg6[%c0_15, %c0_16] : memref<16x128xbf16, #tpu.memory_space<vmem>>, vector<16x128xbf16>
      %19 = arith.extf %18 : vector<16x128xbf16> to vector<16x128xf32>
      %20 = arith.mulf %17, %19 : vector<16x128xf32>
      %21 = arith.truncf %20 : vector<16x128xf32> to vector<16x128xbf16>
      %c0_17 = arith.constant 0 : index
      %c0_18 = arith.constant 0 : index
      %22 = vector.load %arg9[%c0_17, %c0_18] : memref<16x128xbf16, #tpu.memory_space<vmem>>, vector<16x128xbf16>
      tpu.vector_store %arg9[%c0_17, %c0_18], %21 {strides = array<i32>} : memref<16x128xbf16, #tpu.memory_space<vmem>>, vector<16x128xbf16>,
    } else {
    }
    %c0 = arith.constant 0 : index
    %c0_1 = arith.constant 0 : index
    %3 = vector.load %arg9[%c0, %c0_1] : memref<16x128xbf16, #tpu.memory_space<vmem>>, vector<16x128xbf16>
    %c0_2 = arith.constant 0 : index
    %c0_3 = arith.constant 0 : index
    %4 = vector.load %arg5[%c0_2, %c0_3] : memref<128x128xbf16, #tpu.memory_space<vmem>>, vector<128x128xbf16>
    %cst = arith.constant dense<0.000000e+00> : vector<16x128xf32>
    %5 = tpu.matmul %3, %4, %cst {dimension_numbers = #tpu.dot_dimension_numbers<[1], [0], [0], [1], [0, 0, 1, 1], [], []>} : vector<16x128xbf16>, vector<128x128xbf16>, vector<16x128xf32> -> vector<16x128xf32>
    %c0_i32_4 = arith.constant 0 : i32
    %6 = arith.cmpi eq, %arg1, %c0_i32_4 : i32
    %7 = arith.extui %6 : i1 to i32
    %c0_i32_5 = arith.constant 0 : i32
    %8 = arith.cmpi ne, %7, %c0_i32_5 : i32
    scf.if %8 {
      %15 = arith.index_cast %arg2 : i32 to index
      %c0_10 = arith.constant 0 : index
      %c0_11 = arith.constant 0 : index
      %16 = vector.load %arg10[%15, %c0_10, %c0_11] : memref<1x16x128xf32, #tpu.memory_space<vmem>>, vector<1x16x128xf32>
      %17 = vector.shape_cast %16 : vector<1x16x128xf32> to vector<16x128xf32>
      %18 = vector.shape_cast %5 : vector<16x128xf32> to vector<1x16x128xf32>
      tpu.vector_store %arg10[%15, %c0_10, %c0_11], %18 {strides = array<i32>} : memref<1x16x128xf32, #tpu.memory_space<vmem>>, vector<1x16x128xf32>,
    } else {
    }
    %c0_i32_6 = arith.constant 0 : i32
    %9 = arith.cmpi sgt, %arg1, %c0_i32_6 : i32
    %10 = arith.extui %9 : i1 to i32
    %c0_i32_7 = arith.constant 0 : i32
    %11 = arith.cmpi ne, %10, %c0_i32_7 : i32
    scf.if %11 {
      %15 = arith.index_cast %arg2 : i32 to index
      %c0_10 = arith.constant 0 : index
      %c0_11 = arith.constant 0 : index
      %16 = vector.load %arg10[%15, %c0_10, %c0_11] : memref<1x16x128xf32, #tpu.memory_space<vmem>>, vector<1x16x128xf32>
      %17 = vector.shape_cast %16 : vector<1x16x128xf32> to vector<16x128xf32>
      %18 = arith.addf %17, %5 : vector<16x128xf32>
      %19 = arith.index_cast %arg2 : i32 to index
      %c0_12 = arith.constant 0 : index
      %c0_13 = arith.constant 0 : index
      %20 = vector.load %arg10[%19, %c0_12, %c0_13] : memref<1x16x128xf32, #tpu.memory_space<vmem>>, vector<1x16x128xf32>
      %21 = vector.shape_cast %20 : vector<1x16x128xf32> to vector<16x128xf32>
      %22 = vector.shape_cast %18 : vector<16x128xf32> to vector<1x16x128xf32>
      tpu.vector_store %arg10[%19, %c0_12, %c0_13], %22 {strides = array<i32>} : memref<1x16x128xf32, #tpu.memory_space<vmem>>, vector<1x16x128xf32>,
    } else {
    }
    %c0_i32_8 = arith.constant 0 : i32
    %12 = arith.cmpi eq, %arg1, %c0_i32_8 : i32
    %13 = arith.extui %12 : i1 to i32
    %c0_i32_9 = arith.constant 0 : i32
    %14 = arith.cmpi ne, %13, %c0_i32_9 : i32
    scf.if %14 {
      %15 = arith.index_cast %arg2 : i32 to index
      %c0_10 = arith.constant 0 : index
      %c0_11 = arith.constant 0 : index
      %16 = vector.load %arg10[%15, %c0_10, %c0_11] : memref<1x16x128xf32, #tpu.memory_space<vmem>>, vector<1x16x128xf32>
      %17 = vector.shape_cast %16 : vector<1x16x128xf32> to vector<16x128xf32>
      %c0_12 = arith.constant 0 : index
      %c0_13 = arith.constant 0 : index
      %18 = vector.load %arg7[%c0_12, %c0_13] : memref<1x128xf32, #tpu.memory_space<vmem>>, vector<1x128xf32>
      %19 = vector.broadcast %18 : vector<1x128xf32> to vector<16x128xf32>
      %20 = arith.addf %17, %19 : vector<16x128xf32>
      %c0_14 = arith.constant 0 : index
      %c0_15 = arith.constant 0 : index
      %21 = vector.load %arg8[%c0_14, %c0_15] : memref<16x128xf32, #tpu.memory_space<vmem>>, vector<16x128xf32>
      tpu.vector_store %arg8[%c0_14, %c0_15], %20 {strides = array<i32>} : memref<16x128xf32, #tpu.memory_space<vmem>>, vector<16x128xf32>,
    } else {
    }
    return
  }
  func.func @transform_0(%arg0: i32, %arg1: i32, %arg2: i32) -> (i32, i32) {
    %c0_i32 = arith.constant 0 : i32
    %c0_i32_0 = arith.constant 0 : i32
    return %arg0, %c0_i32 : i32, i32
  }
  func.func @transform_1(%arg0: i32, %arg1: i32, %arg2: i32) -> (i32, i32) {
    %c0_i32 = arith.constant 0 : i32
    %c0_i32_0 = arith.constant 0 : i32
    return %c0_i32, %arg1 : i32, i32
  }
  func.func @transform_2(%arg0: i32, %arg1: i32, %arg2: i32) -> (i32, i32) {
    %c0_i32 = arith.constant 0 : i32
    return %arg1, %arg2 : i32, i32
  }
  func.func @transform_3(%arg0: i32, %arg1: i32, %arg2: i32) -> (i32, i32) {
    %c0_i32 = arith.constant 0 : i32
    return %arg0, %arg1 : i32, i32
  }
  func.func @transform_4(%arg0: i32, %arg1: i32, %arg2: i32) -> (i32, i32) {
    %c0_i32 = arith.constant 0 : i32
    %c0_i32_0 = arith.constant 0 : i32
    return %c0_i32, %arg2 : i32, i32
  }
  func.func @transform_5(%arg0: i32, %arg1: i32, %arg2: i32) -> (i32, i32) {
    %c0_i32 = arith.constant 0 : i32
    return %arg0, %arg2 : i32, i32
  }
}

</mosaic_0001>

<bundles_post_ra>
// kernel: linear_component_forward.1
= control target key start
LH: loop header
LB: loop body
LE: loop exit
PB: predicated region body
PF: predicated region fallthrough
CT: control target
= control target key end

     0   :  { %v319_v0 = vmov 0.0   ;;  %vm320_vm0 = vmmov 0   ;;  %vm48_vm1 = vcmask 261120   ;;  %s396_s1 = inlined_call_operand.vmem [shape: bf16[32,128], index: 1, kind: input, shape index: {}]   ;;  %s397_s2 = inlined_call_operand.vmem [shape: bf16[128,128], index: 2, kind: input, shape index: {}]   ;;  %s398_s0 = inlined_call_operand.vmem [shape: bf16[16,32], index: 0, kind: input, shape index: {}]   ;;  %s399_s3 = inlined_call_operand.vmem [shape: bf16[16,128], index: 3, kind: input, shape index: {}]   ;;  %s400_s4 = inlined_call_operand.vmem [shape: f32[1,128], index: 4, kind: input, shape index: {}]   ;;  %s401_s5 = inlined_call_operand.vmem [shape: f32[16,128], index: 5, kind: output, shape index: {}]  }
   0x1   :  { %278 = vmatprep.subr.bf16.mxu0 %v319_v0  ;;  %v308_v1 = vld [vmem:[%s396_s1] sm:$0xff]   ;;  %282 = vmatprep.mubr.msk.bf16.mxu0 %vm320_vm0, %v319_v0  ;;  %v309_v2 = vld [vmem:[%s396_s1 + $0x8] sm:$0xff]   ;;  %v313_v6 = vld [vmem:[%s397_s2 + $0x10] sm:$0xff]  }
   0x2   :  { %286 = vmatprep.subr.bf16.mxu1 %v319_v0  ;;  %302 = vmatprep.mubr.msk.bf16.mxu1 %vm320_vm0, %v319_v0  ;;  %v311_v3 = vld [vmem:[%s397_s2] sm:$0xff]   ;;  %v312_v5 = vld [vmem:[%s397_s2 + $0x8] sm:$0xff]   ;;  %v314_v7 = vld [vmem:[%s397_s2 + $0x18] sm:$0xff]  }
   0x3   :  { %279 = vmatpush3.bf16.msra.mxu0 %v308_v1  ;;  %v310_v4 = vld [vmem:[%s398_s0] sm:$0xff]   ;;  %287 = vmatpush3.bf16.msra.mxu1 %v311_v3  ;;  %v316_v9 = vld [vmem:[%s397_s2 + $0x28] sm:$0xff]   ;;  %v317_v10 = vld [vmem:[%s397_s2 + $0x30] sm:$0xff]  }
   0x4   :  { %280 = vmatprep.subr.bf16.mxu0 %v319_v0  ;;  %288 = vmatprep.subr.bf16.mxu1 %v319_v0  ;;  %v315_v8 = vld [vmem:[%s397_s2 + $0x20] sm:$0xff]   ;;  %v318_v11 = vld [vmem:[%s397_s2 + $0x38] sm:$0xff]  }
   0x5   :  { %v263_v12 = vld [vmem:[%s399_s3] sm:$0xff]  }
   0x6   :  { %v264_v13 = vunpack.c.l.bf16 %v263_v12  ;;  %v265_v14 = vunpack.c.h.bf16 %v263_v12  ;;  %v261_v22 = vld [vmem:[%s400_s4] ss:$0 sm:$0xff] }
   0x7   :  { %281 = vmatpush3.bf16.msra.mxu0 %v309_v2  ;;  %289 = vmatpush3.bf16.msra.mxu1 %v312_v5 }
   0x8   :  { %290 = vmatprep.subr.bf16.mxu1 %v319_v0 }
   0xa   :  { %283 = vmatmul.mubr.msk.bf16.vlgmr.msra.gmra.mrb[0].mxu0 %vm48_vm1, %v310_v4 }
   0xb   :  { %291 = vmatpush3.bf16.msra.mxu1 %v313_v6 }
   0xc   :  { %292 = vmatprep.subr.bf16.mxu1 %v319_v0 }
   0xf   :  { %293 = vmatpush3.bf16.msra.mxu1 %v314_v7 }
  0x10   :  { %294 = vmatprep.subr.bf16.mxu1 %v319_v0 }
  0x13   :  { %295 = vmatpush3.bf16.msra.mxu1 %v315_v8 }
  0x14   :  { %296 = vmatprep.subr.bf16.mxu1 %v319_v0 }
  0x17   :  { %297 = vmatpush3.bf16.msra.mxu1 %v316_v9 }
  0x18   :  { %298 = vmatprep.subr.bf16.mxu1 %v319_v0 }
  0x1b   :  { %299 = vmatpush3.bf16.msra.mxu1 %v317_v10 }
  0x1c   :  { %300 = vmatprep.subr.bf16.mxu1 %v319_v0 }
  0x1f   :  { %301 = vmatpush3.bf16.msra.mxu1 %v318_v11 }
  0xdd   :  { %v86_v15 = vpop.f32.mrb[0].mxu0 }
  0xde   :  { %v284_v16 = vpop.f32.mrb[1].mxu0  ;;  %v97_v18 = vmul.f32 %v264_v13, %v86_v15 }
  0xdf   :  { %v89_v17 = vpop.f32.mrb[2].mxu0 }
  0xe0   :  { %v98_v19 = vmul.f32 %v265_v14, %v89_v17  ;;  %v285_v20 = vpop.f32.mrb[3].mxu0 }
  0xe2   :  { %v99_v21 = vpack.c.bf16 %v98_v19, %v97_v18 }
  0xe4   :  { %303 = vmatmul.mubr.bf16.vlgmr.msra.gmra.mrb[0].mxu1 %v99_v21 }
 0x1b7   :  { %v200_v23 = vpop.f32.mrb[0].mxu1 }
 0x1b8   :  { %v241_v24 = vadd.f32 %v261_v22, %v200_v23  ;;  %v304_v25 = vpop.f32.mrb[1].mxu1 }
 0x1b9   :  { %v203_v26 = vpop.f32.mrb[2].mxu1 }
 0x1ba   :  { %243 = vst [vmem:[%s401_s5] sm:$0xff] %v241_v24  ;;  %v242_v27 = vadd.f32 %v261_v22, %v203_v26  ;;  %v305_v28 = vpop.f32.mrb[3].mxu1 }
 0x1bc   :  { %244 = vst [vmem:[%s401_s5 + $0x8] sm:$0xff] %v242_v27 }

</bundles_post_ra>
